<compile_context>
chip_gen: v5e
topology: v5e:2x2
jax: 0.10.0
libtpu: 0.0.40
codegen_flags: <defaults>
</compile_context>

<pallas_src>
import functools
import math

import jax
import jax.numpy as jnp
from jax.experimental import pallas as pl
from jax.experimental.pallas import tpu as pltpu


# ----------------------------- Pallas kernels ------------------------------ #

def _transform_kernel(x_ref, w_ref, o_ref):
    # x1_tilda tile = X_tile @ W1   (bf16 MXU inputs, f32 accumulate, bf16 out)
    o_ref[...] = jnp.dot(x_ref[...], w_ref[...],
                         preferred_element_type=jnp.float32).astype(o_ref.dtype)


def _agg_transform_kernel(a_ref, t_ref, b_ref, w_ref, o_ref):
    # Fused layer: x2_tilda tile = relu(A_row_block @ x1_tilda + b1) @ W2
    # t_ref is the full (n_pad, h_pad) x1_tilda, VMEM-resident (constant index_map).
    agg = jnp.dot(a_ref[...], t_ref[...], preferred_element_type=jnp.float32)
    x = jnp.maximum(agg + b_ref[...], 0.0)            # relu (dropout = identity, eval)
    o_ref[...] = jnp.dot(x.astype(jnp.bfloat16), w_ref[...],
                         preferred_element_type=jnp.float32).astype(o_ref.dtype)


def _agg_head_kernel(a_ref, t_ref, b_ref, w_ref, bp_ref, o_ref, *, num_classes):
    # Fused layer + head:
    #   out tile = log_softmax(relu(A_row_block @ x2_tilda + b2) @ Wp + bp)
    agg = jnp.dot(a_ref[...], t_ref[...], preferred_element_type=jnp.float32)
    x = jnp.maximum(agg + b_ref[...], 0.0)
    logits = jnp.dot(x.astype(jnp.bfloat16), w_ref[...],
                     preferred_element_type=jnp.float32) + bp_ref[...]
    # Masked log_softmax over the real classes only (lane padding -> 128).
    col = jax.lax.broadcasted_iota(jnp.int32, logits.shape, 1)
    valid = col < num_classes
    neg = jnp.float32(-1e30)
    m = jnp.max(jnp.where(valid, logits, neg), axis=-1, keepdims=True)
    shifted = logits - m
    sumexp = jnp.sum(jnp.where(valid, jnp.exp(shifted), 0.0),
                     axis=-1, keepdims=True)
    o_ref[...] = shifted - jnp.log(sumexp)


# ------------------------------ Wrappers ----------------------------------- #

def _round_up(v, m):
    return ((v + m - 1) // m) * m


def _pad2(x, rows, cols):
    pr, pc = rows - x.shape[0], cols - x.shape[1]
    if pr == 0 and pc == 0:
        return x
    return jnp.pad(x, ((0, pr), (0, pc)))


def _agg_compiler_params(tm, n_pad, h_in, h_out):
    # Explicit VMEM budget: double-buffered A row block + resident t (count x2,
    # conservative) + weights + output block, plus headroom.
    est = (2 * tm * n_pad * 2            # A row block, bf16, double buffered
           + 2 * n_pad * h_in * 2        # resident t, bf16
           + 2 * h_in * h_out * 2        # weight, bf16
           + 2 * tm * h_out * 4          # output block (f32 upper bound)
           + (4 << 20))                  # headroom / biases / misc
    vmem_limit = min(max(est, 32 << 20), 128 << 20)
    return pltpu.CompilerParams(
        dimension_semantics=("parallel",),
        vmem_limit_bytes=vmem_limit)


def _transform(x_bf, w_bf, *, tm):
    n_pad, f_pad = x_bf.shape
    h_pad = w_bf.shape[1]
    return pl.pallas_call(
        _transform_kernel,
        out_shape=jax.ShapeDtypeStruct((n_pad, h_pad), jnp.bfloat16),
        grid_spec=pltpu.PrefetchScalarGridSpec(
            num_scalar_prefetch=0,
            grid=(n_pad // tm,),
            in_specs=[
                pl.BlockSpec((tm, f_pad), lambda i: (i, 0)),
                pl.BlockSpec((f_pad, h_pad), lambda i: (0, 0)),
            ],
            out_specs=pl.BlockSpec((tm, h_pad), lambda i: (i, 0)),
        ),
        compiler_params=pltpu.CompilerParams(
            dimension_semantics=("parallel",)),
    )(x_bf, w_bf)


def _agg_transform(a_bf, t_bf, bias, w_bf, *, tm):
    n_pad = a_bf.shape[0]
    h_in = t_bf.shape[1]
    h_out = w_bf.shape[1]
    return pl.pallas_call(
        _agg_transform_kernel,
        out_shape=jax.ShapeDtypeStruct((n_pad, h_out), jnp.bfloat16),
        grid_spec=pltpu.PrefetchScalarGridSpec(
            num_scalar_prefetch=0,
            grid=(n_pad // tm,),
            in_specs=[
                pl.BlockSpec((tm, n_pad), lambda i: (i, 0)),   # A row block, full K
                pl.BlockSpec((n_pad, h_in), lambda i: (0, 0)),  # resident x1_tilda
                pl.BlockSpec((1, h_in), lambda i: (0, 0)),
                pl.BlockSpec((h_in, h_out), lambda i: (0, 0)),
            ],
            out_specs=pl.BlockSpec((tm, h_out), lambda i: (i, 0)),
        ),
        compiler_params=_agg_compiler_params(tm, n_pad, h_in, h_out),
    )(a_bf, t_bf, bias, w_bf)


def _agg_head(a_bf, t_bf, bias, w_bf, bp, *, num_classes, tm):
    n_pad = a_bf.shape[0]
    h_in = t_bf.shape[1]
    c_pad = w_bf.shape[1]
    kernel = functools.partial(_agg_head_kernel, num_classes=num_classes)
    return pl.pallas_call(
        kernel,
        out_shape=jax.ShapeDtypeStruct((n_pad, c_pad), jnp.float32),
        grid_spec=pltpu.PrefetchScalarGridSpec(
            num_scalar_prefetch=0,
            grid=(n_pad // tm,),
            in_specs=[
                pl.BlockSpec((tm, n_pad), lambda i: (i, 0)),    # A row block, full K
                pl.BlockSpec((n_pad, h_in), lambda i: (0, 0)),   # resident x2_tilda
                pl.BlockSpec((1, h_in), lambda i: (0, 0)),
                pl.BlockSpec((h_in, c_pad), lambda i: (0, 0)),
                pl.BlockSpec((1, c_pad), lambda i: (0, 0)),
            ],
            out_specs=pl.BlockSpec((tm, c_pad), lambda i: (i, 0)),
        ),
        compiler_params=_agg_compiler_params(tm, n_pad, h_in, c_pad),
    )(a_bf, t_bf, bias, w_bf, bp)


def gcn_forward(x, a_hat, params, *, tm=None):
    """Full GCN forward. Returns (log_probs, x1_tilda, x2_tilda)."""
    n, f = x.shape
    h = params["w1"].shape[1]
    c = params["wp"].shape[1]

    if tm is None:
        # >=2 row tiles at tiny N so both v7x TensorCores get work on the
        # "parallel" axis; bigger row tiles for DMA efficiency at real sizes.
        if n <= 256:
            tm = 64
        elif n <= 1024:
            tm = 128
        else:
            tm = 256

    # Pad rows/cols to MXU / lane friendly shapes; real rows / columns are
    # sliced off at the end.  Row padding granularity is lcm(tm, 128) (<=256),
    # so wasted work stays small.
    n_pad = _round_up(n, math.lcm(tm, 128))
    f_pad = _round_up(f, 128)
    h_pad = _round_up(h, 128)
    c_pad = _round_up(c, 128)

    # bf16 MXU operands; biases stay f32 (elementwise math done in f32).
    x_bf = _pad2(x, n_pad, f_pad).astype(jnp.bfloat16)
    a_bf = _pad2(a_hat, n_pad, n_pad).astype(jnp.bfloat16)
    w1_bf = _pad2(params["w1"], f_pad, h_pad).astype(jnp.bfloat16)
    w2_bf = _pad2(params["w2"], h_pad, h_pad).astype(jnp.bfloat16)
    wp_bf = _pad2(params["wp"], h_pad, c_pad).astype(jnp.bfloat16)
    b1 = _pad2(params["b1"], 1, h_pad)
    b2 = _pad2(params["b2"], 1, h_pad)
    bp = _pad2(params["bp"], 1, c_pad)

    # conv1: linear transform (bf16 output feeds kernel 2 directly)
    x1_tilda_p = _transform(x_bf, w1_bf, tm=tm)
    # conv1 aggregation + relu + (eval) dropout fused with conv2 transform
    x2_tilda_p = _agg_transform(a_bf, x1_tilda_p, b1, w2_bf, tm=tm)
    # conv2 aggregation + relu fused with proj + log_softmax
    log_probs_p = _agg_head(a_bf, x2_tilda_p, b2, wp_bf, bp,
                            num_classes=c, tm=tm)

    return (log_probs_p[:n, :c],
            x1_tilda_p[:n, :h].astype(jnp.float32),
            x2_tilda_p[:n, :h].astype(jnp.float32))


# --------------------------- Graph / param setup ---------------------------- #

def build_normalized_adjacency(edge_index, num_nodes):
    """Dense D^{-1/2} (A + I) D^{-1/2} from edge_index [2, E] (glue, plain JAX)."""
    src, dst = edge_index[0], edge_index[1]
    a = jnp.zeros((num_nodes, num_nodes), jnp.float32)
    a = a.at[src, dst].set(1.0)
    a = jnp.maximum(a, a.T)                                    # symmetrize
    a = jnp.maximum(a, jnp.eye(num_nodes, dtype=jnp.float32))  # self loops
    deg = jnp.sum(a, axis=1)
    d_inv_sqrt = 1.0 / jnp.sqrt(jnp.maximum(deg, 1.0))
    return a * d_inv_sqrt[:, None] * d_inv_sqrt[None, :]


def init_params(key, num_features, hidden, num_classes):
    k1, k2, k3 = jax.random.split(key, 3)

    def glorot(k, shape):
        lim = jnp.sqrt(6.0 / (shape[0] + shape[1]))
        return jax.random.uniform(k, shape, jnp.float32, -lim, lim)

    return {
        "w1": glorot(k1, (num_features, hidden)),
        "b1": jnp.zeros((1, hidden), jnp.float32),
        "w2": glorot(k2, (hidden, hidden)),
        "b2": jnp.zeros((1, hidden), jnp.float32),
        "wp": glorot(k3, (hidden, num_classes)),
        "bp": jnp.zeros((1, num_classes), jnp.float32),
    }


def gcn_reference(x, a_hat, params):
    """Pure-JAX f32 reference for correctness checking."""
    x1_t = x @ params["w1"]
    x1 = jnp.maximum(a_hat @ x1_t + params["b1"], 0.0)
    x2_t = x1 @ params["w2"]
    x2 = jnp.maximum(a_hat @ x2_t + params["b2"], 0.0)
    logits = x2 @ params["wp"] + params["bp"]
    return jax.nn.log_softmax(logits, axis=1), x1_t, x2_t


# --------------------------------- main ------------------------------------ #

if __name__ == "__main__":
    NUM_NODES = 128        # small synthetic "Cora"
    NUM_FEATURES = 32
    HIDDEN = 64
    NUM_CLASSES = 8
    NUM_EDGES = 256

    key = jax.random.PRNGKey(0)
    kx, ke, kp = jax.random.split(key, 3)

    x = jax.random.normal(kx, (NUM_NODES, NUM_FEATURES), jnp.float32)
    edge_index = jax.random.randint(ke, (2, NUM_EDGES), 0, NUM_NODES,
                                    dtype=jnp.int32)
    a_hat = build_normalized_adjacency(edge_index, NUM_NODES)
    params = init_params(kp, NUM_FEATURES, HIDDEN, NUM_CLASSES)

    fwd = jax.jit(gcn_forward)
    log_probs, x1_tilda, x2_tilda = fwd(x, a_hat, params)
    jax.block_until_ready((log_probs, x1_tilda, x2_tilda))

    # shape checks
    assert log_probs.shape == (NUM_NODES, NUM_CLASSES)
    assert x1_tilda.shape == (NUM_NODES, HIDDEN)
    assert x2_tilda.shape == (NUM_NODES, HIDDEN)

    # log_softmax rows must (log-)sum to ~0
    row_lse = jax.scipy.special.logsumexp(log_probs, axis=1)
    assert float(jnp.max(jnp.abs(row_lse))) < 1e-4

    # compare against f32 pure-JAX reference (bf16 MXU operands -> loose tolerance)
    ref_lp, ref_x1t, ref_x2t = gcn_reference(x, a_hat, params)
    assert float(jnp.max(jnp.abs(x1_tilda - ref_x1t))) < 1e-1
    assert float(jnp.max(jnp.abs(x2_tilda - ref_x2t))) < 1e-1
    assert float(jnp.max(jnp.abs(log_probs - ref_lp))) < 2e-1

    print("KERNEL_OK")
</pallas_src>

<mosaic_0001>
module attributes {stable_mosaic.version = 11 : i64} {
  func.func @_transform_kernel(%arg0: i32, %arg1: memref<64x128xbf16, #tpu.memory_space<vmem>>, %arg2: memref<128x128xbf16, #tpu.memory_space<vmem>>, %arg3: memref<64x128xbf16, #tpu.memory_space<vmem>>) attributes {dimension_semantics = [#tpu.dimension_semantics<parallel>], iteration_bounds = array<i64: 2>, scalar_prefetch = 0 : i64, scratch_operands = 0 : i64, tpu.core_type = #tpu.core_type<tc>, window_params = [{transform_indices = @transform_0, window_bounds = array<i64: 64, 128>}, {pipeline_mode = #tpu.pipeline_mode<synchronous>, transform_indices = @transform_1, window_bounds = array<i64: 128, 128>}, {transform_indices = @transform_2, window_bounds = array<i64: 64, 128>}]} {
    %c0 = arith.constant 0 : index
    %c0_0 = arith.constant 0 : index
    %0 = vector.load %arg1[%c0, %c0_0] : memref<64x128xbf16, #tpu.memory_space<vmem>>, vector<64x128xbf16>
    %c0_1 = arith.constant 0 : index
    %c0_2 = arith.constant 0 : index
    %1 = vector.load %arg2[%c0_1, %c0_2] : memref<128x128xbf16, #tpu.memory_space<vmem>>, vector<128x128xbf16>
    %cst = arith.constant dense<0.000000e+00> : vector<64x128xf32>
    %2 = tpu.matmul %0, %1, %cst {dimension_numbers = #tpu.dot_dimension_numbers<[1], [0], [0], [1], [0, 0, 1, 1], [], []>} : vector<64x128xbf16>, vector<128x128xbf16>, vector<64x128xf32> -> vector<64x128xf32>
    %3 = arith.truncf %2 : vector<64x128xf32> to vector<64x128xbf16>
    %c0_3 = arith.constant 0 : index
    %c0_4 = arith.constant 0 : index
    %4 = vector.load %arg3[%c0_3, %c0_4] : memref<64x128xbf16, #tpu.memory_space<vmem>>, vector<64x128xbf16>
    tpu.vector_store %arg3[%c0_3, %c0_4], %3 {strides = array<i32>} : memref<64x128xbf16, #tpu.memory_space<vmem>>, vector<64x128xbf16>,
    return
  }
  func.func @transform_0(%arg0: i32) -> (i32, i32) {
    %c0_i32 = arith.constant 0 : i32
    %c0_i32_0 = arith.constant 0 : i32
    return %arg0, %c0_i32 : i32, i32
  }
  func.func @transform_1(%arg0: i32) -> (i32, i32) {
    %c0_i32 = arith.constant 0 : i32
    %c0_i32_0 = arith.constant 0 : i32
    %c0_i32_1 = arith.constant 0 : i32
    return %c0_i32, %c0_i32_0 : i32, i32
  }
  func.func @transform_2(%arg0: i32) -> (i32, i32) {
    %c0_i32 = arith.constant 0 : i32
    %c0_i32_0 = arith.constant 0 : i32
    return %arg0, %c0_i32 : i32, i32
  }
}

module attributes {stable_mosaic.version = 11 : i64} {
  func.func @_agg_head_kernel(%arg0: i32, %arg1: memref<64x128xbf16, #tpu.memory_space<vmem>>, %arg2: memref<128x128xbf16, #tpu.memory_space<vmem>>, %arg3: memref<1x128xf32, #tpu.memory_space<vmem>>, %arg4: memref<128x128xbf16, #tpu.memory_space<vmem>>, %arg5: memref<1x128xf32, #tpu.memory_space<vmem>>, %arg6: memref<64x128xf32, #tpu.memory_space<vmem>>) attributes {dimension_semantics = [#tpu.dimension_semantics<parallel>], iteration_bounds = array<i64: 2>, scalar_prefetch = 0 : i64, scratch_operands = 0 : i64, tpu.core_type = #tpu.core_type<tc>, window_params = [{transform_indices = @transform_0, window_bounds = array<i64: 64, 128>}, {pipeline_mode = #tpu.pipeline_mode<synchronous>, transform_indices = @transform_1, window_bounds = array<i64: 128, 128>}, {pipeline_mode = #tpu.pipeline_mode<synchronous>, transform_indices = @transform_2, window_bounds = array<i64: 1, 128>}, {pipeline_mode = #tpu.pipeline_mode<synchronous>, transform_indices = @transform_3, window_bounds = array<i64: 128, 128>}, {pipeline_mode = #tpu.pipeline_mode<synchronous>, transform_indices = @transform_4, window_bounds = array<i64: 1, 128>}, {transform_indices = @transform_5, window_bounds = array<i64: 64, 128>}]} {
    %c0 = arith.constant 0 : index
    %c0_0 = arith.constant 0 : index
    %0 = vector.load %arg1[%c0, %c0_0] : memref<64x128xbf16, #tpu.memory_space<vmem>>, vector<64x128xbf16>
    %c0_1 = arith.constant 0 : index
    %c0_2 = arith.constant 0 : index
    %1 = vector.load %arg2[%c0_1, %c0_2] : memref<128x128xbf16, #tpu.memory_space<vmem>>, vector<128x128xbf16>
    %cst = arith.constant dense<0.000000e+00> : vector<64x128xf32>
    %2 = tpu.matmul %0, %1, %cst {dimension_numbers = #tpu.dot_dimension_numbers<[1], [0], [0], [1], [0, 0, 1, 1], [], []>} : vector<64x128xbf16>, vector<128x128xbf16>, vector<64x128xf32> -> vector<64x128xf32>
    %c0_3 = arith.constant 0 : index
    %c0_4 = arith.constant 0 : index
    %3 = vector.load %arg3[%c0_3, %c0_4] : memref<1x128xf32, #tpu.memory_space<vmem>>, vector<1x128xf32>
    %4 = vector.broadcast %3 : vector<1x128xf32> to vector<64x128xf32>
    %5 = arith.addf %2, %4 : vector<64x128xf32>
    %cst_5 = arith.constant 0.000000e+00 : f32
    %6 = vector.broadcast %cst_5 : f32 to vector<64x128xf32>
    %7 = arith.maximumf %5, %6 : vector<64x128xf32>
    %8 = arith.truncf %7 : vector<64x128xf32> to vector<64x128xbf16>
    %c0_6 = arith.constant 0 : index
    %c0_7 = arith.constant 0 : index
    %9 = vector.load %arg4[%c0_6, %c0_7] : memref<128x128xbf16, #tpu.memory_space<vmem>>, vector<128x128xbf16>
    %cst_8 = arith.constant dense<0.000000e+00> : vector<64x128xf32>
    %10 = tpu.matmul %8, %9, %cst_8 {dimension_numbers = #tpu.dot_dimension_numbers<[1], [0], [0], [1], [0, 0, 1, 1], [], []>} : vector<64x128xbf16>, vector<128x128xbf16>, vector<64x128xf32> -> vector<64x128xf32>
    %c0_9 = arith.constant 0 : index
    %c0_10 = arith.constant 0 : index
    %11 = vector.load %arg5[%c0_9, %c0_10] : memref<1x128xf32, #tpu.memory_space<vmem>>, vector<1x128xf32>
    %12 = vector.broadcast %11 : vector<1x128xf32> to vector<64x128xf32>
    %13 = arith.addf %10, %12 : vector<64x128xf32>
    %14 = tpu.iota {dimensions = array<i32: 1>} : vector<64x128xi32>
    %c8_i32 = arith.constant 8 : i32
    %15 = vector.broadcast %c8_i32 : i32 to vector<64x128xi32>
    %16 = arith.cmpi slt, %14, %15 : vector<64x128xi32>
    %cst_11 = arith.constant -1.000000e+30 : f32
    %17 = vector.broadcast %cst_11 : f32 to vector<64x128xf32>
    %18 = arith.select %16, %13, %17 : vector<64x128xi1>, vector<64x128xf32>
    %cst_12 = arith.constant dense<0xFF800000> : vector<64xf32>
    %19 = vector.multi_reduction <maximumf>, %18, %cst_12 [1] : vector<64x128xf32> to vector<64xf32>
    %20 = vector.shape_cast %19 : vector<64xf32> to vector<64x1xf32>
    %21 = vector.broadcast %20 : vector<64x1xf32> to vector<64x128xf32>
    %22 = arith.subf %13, %21 : vector<64x128xf32>
    %23 = math.exp %22 : vector<64x128xf32>
    %cst_13 = arith.constant 0.000000e+00 : f32
    %24 = vector.broadcast %cst_13 : f32 to vector<64x128xf32>
    %25 = arith.select %16, %23, %24 : vector<64x128xi1>, vector<64x128xf32>
    %cst_14 = arith.constant dense<0.000000e+00> : vector<64xf32>
    %26 = vector.multi_reduction <add>, %25, %cst_14 [1] : vector<64x128xf32> to vector<64xf32>
    %27 = vector.shape_cast %26 : vector<64xf32> to vector<64x1xf32>
    %28 = math.log %27 : vector<64x1xf32>
    %29 = vector.broadcast %28 : vector<64x1xf32> to vector<64x128xf32>
    %30 = arith.subf %22, %29 : vector<64x128xf32>
    %c0_15 = arith.constant 0 : index
    %c0_16 = arith.constant 0 : index
    %31 = vector.load %arg6[%c0_15, %c0_16] : memref<64x128xf32, #tpu.memory_space<vmem>>, vector<64x128xf32>
    tpu.vector_store %arg6[%c0_15, %c0_16], %30 {strides = array<i32>} : memref<64x128xf32, #tpu.memory_space<vmem>>, vector<64x128xf32>,
    return
  }
  func.func @transform_0(%arg0: i32) -> (i32, i32) {
    %c0_i32 = arith.constant 0 : i32
    %c0_i32_0 = arith.constant 0 : i32
    return %arg0, %c0_i32 : i32, i32
  }
  func.func @transform_1(%arg0: i32) -> (i32, i32) {
    %c0_i32 = arith.constant 0 : i32
    %c0_i32_0 = arith.constant 0 : i32
    %c0_i32_1 = arith.constant 0 : i32
    return %c0_i32, %c0_i32_0 : i32, i32
  }
  func.func @transform_2(%arg0: i32) -> (i32, i32) {
    %c0_i32 = arith.constant 0 : i32
    %c0_i32_0 = arith.constant 0 : i32
    %c0_i32_1 = arith.constant 0 : i32
    return %c0_i32, %c0_i32_0 : i32, i32
  }
  func.func @transform_3(%arg0: i32) -> (i32, i32) {
    %c0_i32 = arith.constant 0 : i32
    %c0_i32_0 = arith.constant 0 : i32
    %c0_i32_1 = arith.constant 0 : i32
    return %c0_i32, %c0_i32_0 : i32, i32
  }
  func.func @transform_4(%arg0: i32) -> (i32, i32) {
    %c0_i32 = arith.constant 0 : i32
    %c0_i32_0 = arith.constant 0 : i32
    %c0_i32_1 = arith.constant 0 : i32
    return %c0_i32, %c0_i32_0 : i32, i32
  }
  func.func @transform_5(%arg0: i32) -> (i32, i32) {
    %c0_i32 = arith.constant 0 : i32
    %c0_i32_0 = arith.constant 0 : i32
    return %arg0, %c0_i32 : i32, i32
  }
}

module attributes {stable_mosaic.version = 11 : i64} {
  func.func @_agg_transform_kernel(%arg0: i32, %arg1: memref<64x128xbf16, #tpu.memory_space<vmem>>, %arg2: memref<128x128xbf16, #tpu.memory_space<vmem>>, %arg3: memref<1x128xf32, #tpu.memory_space<vmem>>, %arg4: memref<128x128xbf16, #tpu.memory_space<vmem>>, %arg5: memref<64x128xbf16, #tpu.memory_space<vmem>>) attributes {dimension_semantics = [#tpu.dimension_semantics<parallel>], iteration_bounds = array<i64: 2>, scalar_prefetch = 0 : i64, scratch_operands = 0 : i64, tpu.core_type = #tpu.core_type<tc>, window_params = [{transform_indices = @transform_0, window_bounds = array<i64: 64, 128>}, {pipeline_mode = #tpu.pipeline_mode<synchronous>, transform_indices = @transform_1, window_bounds = array<i64: 128, 128>}, {pipeline_mode = #tpu.pipeline_mode<synchronous>, transform_indices = @transform_2, window_bounds = array<i64: 1, 128>}, {pipeline_mode = #tpu.pipeline_mode<synchronous>, transform_indices = @transform_3, window_bounds = array<i64: 128, 128>}, {transform_indices = @transform_4, window_bounds = array<i64: 64, 128>}]} {
    %c0 = arith.constant 0 : index
    %c0_0 = arith.constant 0 : index
    %0 = vector.load %arg1[%c0, %c0_0] : memref<64x128xbf16, #tpu.memory_space<vmem>>, vector<64x128xbf16>
    %c0_1 = arith.constant 0 : index
    %c0_2 = arith.constant 0 : index
    %1 = vector.load %arg2[%c0_1, %c0_2] : memref<128x128xbf16, #tpu.memory_space<vmem>>, vector<128x128xbf16>
    %cst = arith.constant dense<0.000000e+00> : vector<64x128xf32>
    %2 = tpu.matmul %0, %1, %cst {dimension_numbers = #tpu.dot_dimension_numbers<[1], [0], [0], [1], [0, 0, 1, 1], [], []>} : vector<64x128xbf16>, vector<128x128xbf16>, vector<64x128xf32> -> vector<64x128xf32>
    %c0_3 = arith.constant 0 : index
    %c0_4 = arith.constant 0 : index
    %3 = vector.load %arg3[%c0_3, %c0_4] : memref<1x128xf32, #tpu.memory_space<vmem>>, vector<1x128xf32>
    %4 = vector.broadcast %3 : vector<1x128xf32> to vector<64x128xf32>
    %5 = arith.addf %2, %4 : vector<64x128xf32>
    %cst_5 = arith.constant 0.000000e+00 : f32
    %6 = vector.broadcast %cst_5 : f32 to vector<64x128xf32>
    %7 = arith.maximumf %5, %6 : vector<64x128xf32>
    %8 = arith.truncf %7 : vector<64x128xf32> to vector<64x128xbf16>
    %c0_6 = arith.constant 0 : index
    %c0_7 = arith.constant 0 : index
    %9 = vector.load %arg4[%c0_6, %c0_7] : memref<128x128xbf16, #tpu.memory_space<vmem>>, vector<128x128xbf16>
    %cst_8 = arith.constant dense<0.000000e+00> : vector<64x128xf32>
    %10 = tpu.matmul %8, %9, %cst_8 {dimension_numbers = #tpu.dot_dimension_numbers<[1], [0], [0], [1], [0, 0, 1, 1], [], []>} : vector<64x128xbf16>, vector<128x128xbf16>, vector<64x128xf32> -> vector<64x128xf32>
    %11 = arith.truncf %10 : vector<64x128xf32> to vector<64x128xbf16>
    %c0_9 = arith.constant 0 : index
    %c0_10 = arith.constant 0 : index
    %12 = vector.load %arg5[%c0_9, %c0_10] : memref<64x128xbf16, #tpu.memory_space<vmem>>, vector<64x128xbf16>
    tpu.vector_store %arg5[%c0_9, %c0_10], %11 {strides = array<i32>} : memref<64x128xbf16, #tpu.memory_space<vmem>>, vector<64x128xbf16>,
    return
  }
  func.func @transform_0(%arg0: i32) -> (i32, i32) {
    %c0_i32 = arith.constant 0 : i32
    %c0_i32_0 = arith.constant 0 : i32
    return %arg0, %c0_i32 : i32, i32
  }
  func.func @transform_1(%arg0: i32) -> (i32, i32) {
    %c0_i32 = arith.constant 0 : i32
    %c0_i32_0 = arith.constant 0 : i32
    %c0_i32_1 = arith.constant 0 : i32
    return %c0_i32, %c0_i32_0 : i32, i32
  }
  func.func @transform_2(%arg0: i32) -> (i32, i32) {
    %c0_i32 = arith.constant 0 : i32
    %c0_i32_0 = arith.constant 0 : i32
    %c0_i32_1 = arith.constant 0 : i32
    return %c0_i32, %c0_i32_0 : i32, i32
  }
  func.func @transform_3(%arg0: i32) -> (i32, i32) {
    %c0_i32 = arith.constant 0 : i32
    %c0_i32_0 = arith.constant 0 : i32
    %c0_i32_1 = arith.constant 0 : i32
    return %c0_i32, %c0_i32_0 : i32, i32
  }
  func.func @transform_4(%arg0: i32) -> (i32, i32) {
    %c0_i32 = arith.constant 0 : i32
    %c0_i32_0 = arith.constant 0 : i32
    return %arg0, %c0_i32 : i32, i32
  }
}

</mosaic_0001>

<bundles_post_ra>
// kernel: gcn_forward.4
= control target key start
LH: loop header
LB: loop body
LE: loop exit
PB: predicated region body
PF: predicated region fallthrough
CT: control target
= control target key end

     0   :  { %s699_s15 = smov 0   ;;  %s774_s0 = inlined_call_operand.vmem [shape: bf16[128,128], index: 0, kind: input, shape index: {}]   ;;  %s775_s1 = inlined_call_operand.vmem [shape: bf16[128,128], index: 1, kind: input, shape index: {}]   ;;  %s776_s2 = inlined_call_operand.vmem [shape: f32[1,128], index: 2, kind: input, shape index: {}]   ;;  %s777_s3 = inlined_call_operand.vmem [shape: bf16[128,128], index: 3, kind: input, shape index: {}]   ;;  %s778_s4 = inlined_call_operand.vmem [shape: bf16[128,128], index: 4, kind: output, shape index: {}]  }
   0x1 LB: > { %s507_s16 = sadd.s32 4294967295, %s672_s15   ;;  %p511_p0 = scmp.ge.s32.totalorder %s672_s15, 1  ;;  %s672_s15 = sphi %s699_s15, %s14_s15  }
   0x2   : > { %p163_p1 = scmp.lt.s32.totalorder %s672_s15, 3 }
   0x4   : > { %p164_p2 = pnand %p511_p0, %p163_p1 }
   0x5   : > { %s512_s25 = sshll.u32 (!%p164_p2), %s507_s16, 3 }
   0x6   : > { %167 = sbr.rel (%p164_p2) target bundleno = 348 (0x15c), region = 36  ;;  %p190_p3 = scmp.lt.s32.totalorder (!%p164_p2), %s512_s25, 15 }
   0xb   : > { %v609_v0 = vld [vmem:[%s775_s1 + $0x38] sm:$0xff]  ;;  %v608_v1 = vld [vmem:[%s775_s1 + $0x30] sm:$0xff]  ;;  %v607_v2 = vld [vmem:[%s775_s1 + $0x28] sm:$0xff]  ;;  %s780_s25 = smov (!%p190_p3, %s512_s25), 15 }
   0xc   : > { %301 = vmatpush.bf16.msra.mxu0 %v609_v0  ;;  %641 = vmatpush.bf16.msra.mxu2 %v609_v0  ;;  %v606_v3 = vld [vmem:[%s775_s1 + $0x20] sm:$0xff]  ;;  %v605_v4 = vld [vmem:[%s775_s1 + $0x18] sm:$0xff]  ;;  %v604_v6 = vld [vmem:[%s775_s1 + $0x10] sm:$0xff]  ;;  %s513_s10 = sshll.u32 %s780_s25, 2 }
   0xd   : > { %v617_v5 = vld [vmem:[%s777_s3 + $0x38] sm:$0xff]  ;;  %v616_v7 = vld [vmem:[%s777_s3 + $0x30] sm:$0xff]  ;;  %v603_v8 = vld [vmem:[%s775_s1 + $0x8] sm:$0xff]  ;;  %s193_s18 = scalar_lea.vmem %s774_s0, %s513_s10  ;;  %s199_s8 = scalar_lea.vmem %s778_s4, %s513_s10 }
   0xe   : > { %406 = vmatpush.bf16.msra.mxu1 %v617_v5  ;;  %649 = vmatpush.bf16.msra.mxu3 %v617_v5  ;;  %v615_v9 = vld [vmem:[%s777_s3 + $0x28] sm:$0xff]  ;;  %v602_v10 = vld [vmem:[%s775_s1] sm:$0xff]  ;;  %v600_v13 = vld [vmem:[%s193_s18 + $0x10] sm:$0xff] }
   0xf   : > { %v614_v11 = vld [vmem:[%s777_s3 + $0x20] sm:$0xff]  ;;  %v599_v14 = vld [vmem:[%s193_s18 + $0x8] sm:$0xff]  ;;  %v601_v15 = vld [vmem:[%s193_s18 + $0x18] sm:$0xff] }
  0x10   : > { %302 = vmatpush.bf16.msra.mxu0 %v608_v1  ;;  %642 = vmatpush.bf16.msra.mxu2 %v608_v1  ;;  %v598_v12 = vld [vmem:[%s193_s18] sm:$0xff]  ;;  %v613_v16 = vld [vmem:[%s777_s3 + $0x18] sm:$0xff]  ;;  %v612_v17 = vld [vmem:[%s777_s3 + $0x10] sm:$0xff] }
  0x11   : > { %v611_v18 = vld [vmem:[%s777_s3 + $0x8] sm:$0xff]  ;;  %v610_v19 = vld [vmem:[%s777_s3] sm:$0xff] }
  0x12   : > { %407 = vmatpush.bf16.msra.mxu1 %v616_v7  ;;  %650 = vmatpush.bf16.msra.mxu3 %v616_v7  ;;  %v665_v21 = vld [vmem:[%s776_s2] ss:$0 sm:$0xff] }
  0x14   : > { %303 = vmatpush.bf16.msra.mxu0 %v607_v2  ;;  %643 = vmatpush.bf16.msra.mxu2 %v607_v2 }
  0x16   : > { %408 = vmatpush.bf16.msra.mxu1 %v615_v9  ;;  %651 = vmatpush.bf16.msra.mxu3 %v615_v9 }
  0x18   : > { %304 = vmatpush.bf16.msra.mxu0 %v606_v3  ;;  %644 = vmatpush.bf16.msra.mxu2 %v606_v3 }
  0x1a   : > { %409 = vmatpush.bf16.msra.mxu1 %v614_v11  ;;  %652 = vmatpush.bf16.msra.mxu3 %v614_v11 }
  0x1c   : > { %305 = vmatpush.bf16.msra.mxu0 %v605_v4  ;;  %645 = vmatpush.bf16.msra.mxu2 %v605_v4 }
  0x1e   : > { %410 = vmatpush.bf16.msra.mxu1 %v613_v16  ;;  %653 = vmatpush.bf16.msra.mxu3 %v613_v16 }
  0x20   : > { %306 = vmatpush.bf16.msra.mxu0 %v604_v6  ;;  %646 = vmatpush.bf16.msra.mxu2 %v604_v6 }
  0x22   : > { %411 = vmatpush.bf16.msra.mxu1 %v612_v17  ;;  %654 = vmatpush.bf16.msra.mxu3 %v612_v17 }
  0x24   : > { %307 = vmatpush.bf16.msra.mxu0 %v603_v8  ;;  %647 = vmatpush.bf16.msra.mxu2 %v603_v8 }
  0x26   : > { %412 = vmatpush.bf16.msra.mxu1 %v611_v18  ;;  %655 = vmatpush.bf16.msra.mxu3 %v611_v18 }
  0x28   : > { %308 = vmatpush.bf16.msra.mxu0 %v602_v10  ;;  %648 = vmatpush.bf16.msra.mxu2 %v602_v10 }
  0x2a   : > { %413 = vmatpush.bf16.msra.mxu1 %v610_v19  ;;  %656 = vmatpush.bf16.msra.mxu3 %v610_v19 }
  0x2b   : > { %309 = vmatmul.bf16.vlgmr.msra.gmra.mxu0 %v598_v12  ;;  %319 = vmatmul.bf16.vlgmr.msra.gmra.mxu2 %v600_v13 }
  0x3b   : > { %314 = vmatmul.bf16.gmra.mxu0 %v599_v14  ;;  %324 = vmatmul.bf16.gmra.mxu2 %v601_v15 }
  0xa8   : > { %v310_v20 = vpop.f32.mrf.mxu0 }
  0xa9   : > { %v311_v22 = vadd.f32 %v665_v21, %v310_v20 }
  0xab   : > { %v330_v25 = vmax.f32 %v311_v22, 0.0 }
  0xae   : > { %v320_v23 = vpop.f32.mrf.mxu2 }
  0xaf   : > { %v321_v28 = vadd.f32 %v665_v21, %v320_v23 }
  0xb0   : > { %v312_v24 = vpop.f32.mrf.mxu0 }
  0xb1   : > { %v313_v26 = vadd.f32 %v665_v21, %v312_v24  ;;  %v334_v33 = vmax.f32 %v321_v28, 0.0 }
  0xb3   : > { %v331_v27 = vmax.f32 %v313_v26, 0.0 }
  0xb5   : > { %v338_v29 = vpack.c.bf16 %v331_v27, %v330_v25 }
  0xb6   : > { %v322_v30 = vpop.f32.mrf.mxu2 }
  0xb7   : > { %v323_v31 = vadd.f32 %v665_v21, %v322_v30  ;;  %414 = vmatmul.bf16.vlgmr.msra.gmra.mxu1 %v338_v29 }
  0xb8   : > { %v315_v32 = vpop.f32.mrf.mxu0 }
  0xb9   : > { %v335_v34 = vmax.f32 %v323_v31, 0.0  ;;  %v316_v36 = vadd.f32 %v665_v21, %v315_v32 }
  0xbb   : > { %v340_v35 = vpack.c.bf16 %v335_v34, %v334_v33  ;;  %v332_v39 = vmax.f32 %v316_v36, 0.0 }
  0xbd   : > { %424 = vmatmul.bf16.vlgmr.msra.gmra.mxu3 %v340_v35 }
  0xbe   : > { %v325_v37 = vpop.f32.mrf.mxu2 }
  0xbf   : > { %v326_v42 = vadd.f32 %v665_v21, %v325_v37 }
  0xc0   : > { %v317_v38 = vpop.f32.mrf.mxu0 }
  0xc1   : > { %v318_v40 = vadd.f32 %v665_v21, %v317_v38  ;;  %v336_v46 = vmax.f32 %v326_v42, 0.0 }
  0xc3   : > { %v333_v41 = vmax.f32 %v318_v40, 0.0 }
  0xc5   : > { %v339_v43 = vpack.c.bf16 %v333_v41, %v332_v39 }
  0xc6   : > { %v327_v44 = vpop.f32.mrf.mxu2 }
  0xc7   : > { %v328_v45 = vadd.f32 %v665_v21, %v327_v44  ;;  %419 = vmatmul.bf16.gmra.mxu1 %v339_v43 }
  0xc9   : > { %v337_v47 = vmax.f32 %v328_v45, 0.0 }
  0xcb   : > { %v341_v48 = vpack.c.bf16 %v337_v47, %v336_v46 }
  0xcd   : > { %429 = vmatmul.bf16.gmra.mxu3 %v341_v48 }
 0x134   : > { %v415_v49 = vpop.f32.mrf.mxu1 }
 0x13c   : > { %v417_v50 = vpop.f32.mrf.mxu1 }
 0x13d   : > { %v621_v51 = vpack.c.bf16 %v417_v50, %v415_v49 }
 0x13f   : > { %622 = vst [vmem:[%s199_s8] sm:$0xff] %v621_v51  }
 0x140   : > { %v425_v52 = vpop.f32.mrf.mxu3 }
 0x144   : > { %v420_v53 = vpop.f32.mrf.mxu1 }
 0x148   : > { %v427_v54 = vpop.f32.mrf.mxu3 }
 0x149   : > { %v631_v55 = vpack.c.bf16 %v427_v54, %v425_v52 }
 0x14b   : > { %639 = vst [vmem:[%s199_s8 + $0x10] sm:$0xff] %v631_v55  }
 0x14c   : > { %v422_v56 = vpop.f32.mrf.mxu1 }
 0x14d   : > { %v626_v57 = vpack.c.bf16 %v422_v56, %v420_v53 }
 0x14f   : > { %638 = vst [vmem:[%s199_s8 + $0x8] sm:$0xff] %v626_v57  }
 0x150   : > { %v430_v58 = vpop.f32.mrf.mxu3 }
 0x158   : > { %v432_v59 = vpop.f32.mrf.mxu3 }
 0x159   : > { %v636_v60 = vpack.c.bf16 %v432_v59, %v430_v58 }
 0x15b   : > { %640 = vst [vmem:[%s199_s8 + $0x18] sm:$0xff] %v636_v60  }
 0x15c PF: > { %s14_s15 = sadd.s32 1, %s672_s15  }
 0x15d   : > { %p11_p4 = scmp.ge.s32.totalorder %s14_s15, 4  }
 0x15f   :  { %13 = sbr.rel (!%p11_p4) target bundleno = 1 (0x1), region = 66 }

// kernel: gcn_forward.3
= control target key start
LH: loop header
LB: loop body
LE: loop exit
PB: predicated region body
PF: predicated region fallthrough
CT: control target
= control target key end

     0   :  { %s493_s9 = smov 0   ;;  %s537_s0 = inlined_call_operand.vmem [shape: bf16[128,128], index: 0, kind: input, shape index: {}]   ;;  %s538_s1 = inlined_call_operand.vmem [shape: bf16[128,128], index: 1, kind: input, shape index: {}]   ;;  %s539_s2 = inlined_call_operand.vmem [shape: bf16[128,128], index: 2, kind: output, shape index: {}]  }
   0x1 LB: > { %s344_s10 = sadd.s32 4294967295, %s476_s9   ;;  %p348_p0 = scmp.ge.s32.totalorder %s476_s9, 1  ;;  %s476_s9 = sphi %s493_s9, %s12_s9  }
   0x2   : > { %p113_p1 = scmp.lt.s32.totalorder %s476_s9, 3 }
   0x4   : > { %p114_p2 = pnand %p348_p0, %p113_p1 }
   0x5   : > { %s349_s19 = sshll.u32 (!%p114_p2), %s344_s10, 3 }
   0x6   : > { %117 = sbr.rel (%p114_p2) target bundleno = 188 (0xbc), region = 28  ;;  %p136_p3 = scmp.lt.s32.totalorder (!%p114_p2), %s349_s19, 15 }
   0xb   : > { %v414_v0 = vld [vmem:[%s538_s1 + $0x38] sm:$0xff]  ;;  %v413_v1 = vld [vmem:[%s538_s1 + $0x30] sm:$0xff]  ;;  %v412_v2 = vld [vmem:[%s538_s1 + $0x28] sm:$0xff]  ;;  %s541_s19 = smov (!%p136_p3, %s349_s19), 15 }
   0xc   : > { %243 = vmatpush.bf16.msra.mxu0 %v414_v0  ;;  %438 = vmatpush.bf16.msra.mxu1 %v414_v0  ;;  %v411_v3 = vld [vmem:[%s538_s1 + $0x20] sm:$0xff]  ;;  %v410_v4 = vld [vmem:[%s538_s1 + $0x18] sm:$0xff]  ;;  %v409_v5 = vld [vmem:[%s538_s1 + $0x10] sm:$0xff]  ;;  %s350_s26 = sshll.u32 %s541_s19, 2 }
   0xd   : > { %439 = vmatpush.bf16.msra.mxu2 %v414_v0  ;;  %440 = vmatpush.bf16.msra.mxu3 %v414_v0  ;;  %v408_v6 = vld [vmem:[%s538_s1 + $0x8] sm:$0xff]  ;;  %v407_v7 = vld [vmem:[%s538_s1] sm:$0xff]  ;;  %s139_s3 = scalar_lea.vmem %s537_s0, %s350_s26  ;;  %s145_s6 = scalar_lea.vmem %s539_s2, %s350_s26 }
   0xe   : > { %v403_v8 = vld [vmem:[%s139_s3] sm:$0xff]  ;;  %v404_v9 = vld [vmem:[%s139_s3 + $0x8] sm:$0xff]  ;;  %v405_v10 = vld [vmem:[%s139_s3 + $0x10] sm:$0xff] }
   0xf   : > { %v406_v11 = vld [vmem:[%s139_s3 + $0x18] sm:$0xff] }
  0x10   : > { %244 = vmatpush.bf16.msra.mxu0 %v413_v1  ;;  %441 = vmatpush.bf16.msra.mxu1 %v413_v1 }
  0x11   : > { %442 = vmatpush.bf16.msra.mxu2 %v413_v1  ;;  %443 = vmatpush.bf16.msra.mxu3 %v413_v1 }
  0x14   : > { %245 = vmatpush.bf16.msra.mxu0 %v412_v2  ;;  %444 = vmatpush.bf16.msra.mxu1 %v412_v2 }
  0x15   : > { %445 = vmatpush.bf16.msra.mxu2 %v412_v2  ;;  %446 = vmatpush.bf16.msra.mxu3 %v412_v2 }
  0x18   : > { %246 = vmatpush.bf16.msra.mxu0 %v411_v3  ;;  %447 = vmatpush.bf16.msra.mxu1 %v411_v3 }
  0x19   : > { %448 = vmatpush.bf16.msra.mxu2 %v411_v3  ;;  %449 = vmatpush.bf16.msra.mxu3 %v411_v3 }
  0x1c   : > { %247 = vmatpush.bf16.msra.mxu0 %v410_v4  ;;  %450 = vmatpush.bf16.msra.mxu1 %v410_v4 }
  0x1d   : > { %451 = vmatpush.bf16.msra.mxu2 %v410_v4  ;;  %452 = vmatpush.bf16.msra.mxu3 %v410_v4 }
  0x20   : > { %248 = vmatpush.bf16.msra.mxu0 %v409_v5  ;;  %453 = vmatpush.bf16.msra.mxu1 %v409_v5 }
  0x21   : > { %454 = vmatpush.bf16.msra.mxu2 %v409_v5  ;;  %455 = vmatpush.bf16.msra.mxu3 %v409_v5 }
  0x24   : > { %249 = vmatpush.bf16.msra.mxu0 %v408_v6  ;;  %456 = vmatpush.bf16.msra.mxu1 %v408_v6 }
  0x25   : > { %457 = vmatpush.bf16.msra.mxu2 %v408_v6  ;;  %458 = vmatpush.bf16.msra.mxu3 %v408_v6 }
  0x28   : > { %250 = vmatpush.bf16.msra.mxu0 %v407_v7  ;;  %459 = vmatpush.bf16.msra.mxu1 %v407_v7 }
  0x29   : > { %460 = vmatpush.bf16.msra.mxu2 %v407_v7  ;;  %461 = vmatpush.bf16.msra.mxu3 %v407_v7 }
  0x2b   : > { %251 = vmatmul.bf16.vlgmr.msra.gmra.mxu0 %v403_v8  ;;  %256 = vmatmul.bf16.vlgmr.msra.gmra.mxu1 %v404_v9 }
  0x2c   : > { %261 = vmatmul.bf16.vlgmr.msra.gmra.mxu2 %v405_v10  ;;  %266 = vmatmul.bf16.vlgmr.msra.gmra.mxu3 %v406_v11 }
  0xa8   : > { %v252_v12 = vpop.f32.mrf.mxu0  ;;  %v257_v13 = vpop.f32.mrf.mxu1 }
  0xaf   : > { %v262_v14 = vpop.f32.mrf.mxu2  ;;  %v267_v15 = vpop.f32.mrf.mxu3 }
  0xb0   : > { %v254_v16 = vpop.f32.mrf.mxu0  ;;  %v259_v17 = vpop.f32.mrf.mxu1 }
  0xb1   : > { %v418_v18 = vpack.c.bf16 %v254_v16, %v252_v12  ;;  %v423_v19 = vpack.c.bf16 %v259_v17, %v257_v13 }
  0xb3   : > { %419 = vst [vmem:[%s145_s6] sm:$0xff] %v418_v18  }
  0xb4   : > { %435 = vst [vmem:[%s145_s6 + $0x8] sm:$0xff] %v423_v19  }
  0xb7   : > { %v264_v20 = vpop.f32.mrf.mxu2  ;;  %v269_v21 = vpop.f32.mrf.mxu3 }
  0xb8   : > { %v428_v22 = vpack.c.bf16 %v264_v20, %v262_v14  ;;  %v433_v23 = vpack.c.bf16 %v269_v21, %v267_v15 }
  0xba   : > { %436 = vst [vmem:[%s145_s6 + $0x10] sm:$0xff] %v428_v22  }
  0xbb   : > { %437 = vst [vmem:[%s145_s6 + $0x18] sm:$0xff] %v433_v23  }
  0xbc PF: > { %s12_s9 = sadd.s32 1, %s476_s9  }
  0xbd   : > { %p9_p4 = scmp.ge.s32.totalorder %s12_s9, 4  }
  0xbf   :  { %11 = sbr.rel (!%p9_p4) target bundleno = 1 (0x1), region = 58 }

// kernel: gcn_forward.5
= control target key start
LH: loop header
LB: loop body
LE: loop exit
PB: predicated region body
PF: predicated region fallthrough
CT: control target
= control target key end

     0   :  { %s836_s18 = smov 0   ;;  %s984_s0 = inlined_call_operand.vmem [shape: bf16[128,128], index: 0, kind: input, shape index: {}]   ;;  %s985_s1 = inlined_call_operand.vmem [shape: bf16[128,128], index: 1, kind: input, shape index: {}]   ;;  %s986_s2 = inlined_call_operand.vmem [shape: f32[1,128], index: 2, kind: input, shape index: {}]   ;;  %s987_s3 = inlined_call_operand.vmem [shape: bf16[128,128], index: 3, kind: input, shape index: {}]   ;;  %s988_s4 = inlined_call_operand.vmem [shape: f32[1,128], index: 4, kind: input, shape index: {}]   ;;  %s989_s5 = inlined_call_operand.vmem [shape: f32[128,128], index: 5, kind: output, shape index: {}]  }
   0x1 LB: > { %s629_s19 = sadd.s32 4294967295, %s804_s18   ;;  %p633_p0 = scmp.ge.s32.totalorder %s804_s18, 1  ;;  %s804_s18 = sphi %s836_s18, %s15_s18  }
   0x2   : > { %p188_p1 = scmp.lt.s32.totalorder %s804_s18, 3 }
   0x4   : > { %p189_p2 = pnand %p633_p0, %p188_p1 }
   0x5   : > { %s634_s28 = sshll.u32 (!%p189_p2), %s629_s19, 3 }
   0x6   : > { %192 = sbr.rel (%p189_p2) target bundleno = 604 (0x25c), region = 40  ;;  %p217_p3 = scmp.lt.s32.totalorder (!%p189_p2), %s634_s28, 15 }
   0xb   : > { %v731_v0 = vld [vmem:[%s985_s1 + $0x38] sm:$0xff]  ;;  %v730_v1 = vld [vmem:[%s985_s1 + $0x30] sm:$0xff]  ;;  %v729_v2 = vld [vmem:[%s985_s1 + $0x28] sm:$0xff]  ;;  %s991_s28 = smov (!%p217_p3, %s634_s28), 15  ;;  %v466_v49 = vlaneseq }
   0xc   : > { %328 = vmatpush.bf16.msra.mxu0 %v731_v0  ;;  %740 = vmatpush.bf16.msra.mxu2 %v731_v0  ;;  %v728_v3 = vld [vmem:[%s985_s1 + $0x20] sm:$0xff]  ;;  %v727_v4 = vld [vmem:[%s985_s1 + $0x18] sm:$0xff]  ;;  %v726_v6 = vld [vmem:[%s985_s1 + $0x10] sm:$0xff]  ;;  %s635_s14 = sshll.u32 %s991_s28, 2  ;;  %s637_s13 = sshll.u32 %s991_s28, 3 }
   0xd   : > { %v739_v5 = vld [vmem:[%s987_s3 + $0x38] sm:$0xff]  ;;  %v738_v7 = vld [vmem:[%s987_s3 + $0x30] sm:$0xff]  ;;  %v725_v8 = vld [vmem:[%s985_s1 + $0x8] sm:$0xff]  ;;  %s220_s22 = scalar_lea.vmem %s984_s0, %s635_s14  ;;  %v901_v50 = vand.u32 127, %v466_v49  ;;  %s964_s16 = scalar_lea.vmem %s989_s5, %s637_s13 }
   0xe   : > { %437 = vmatpush.bf16.msra.mxu1 %v739_v5  ;;  %748 = vmatpush.bf16.msra.mxu3 %v739_v5  ;;  %v737_v9 = vld [vmem:[%s987_s3 + $0x28] sm:$0xff]  ;;  %v724_v10 = vld [vmem:[%s985_s1] sm:$0xff]  ;;  %v722_v13 = vld [vmem:[%s220_s22 + $0x10] sm:$0xff] }
   0xf   : > { %v736_v11 = vld [vmem:[%s987_s3 + $0x20] sm:$0xff]  ;;  %v721_v14 = vld [vmem:[%s220_s22 + $0x8] sm:$0xff]  ;;  %v723_v15 = vld [vmem:[%s220_s22 + $0x18] sm:$0xff]  ;;  %vm468_vm0 = vcmp.lt.s32.totalorder %v901_v50, 8 }
  0x10   : > { %329 = vmatpush.bf16.msra.mxu0 %v730_v1  ;;  %741 = vmatpush.bf16.msra.mxu2 %v730_v1  ;;  %v720_v12 = vld [vmem:[%s220_s22] sm:$0xff]  ;;  %v735_v16 = vld [vmem:[%s987_s3 + $0x18] sm:$0xff]  ;;  %v734_v17 = vld [vmem:[%s987_s3 + $0x10] sm:$0xff] }
  0x11   : > { %v733_v18 = vld [vmem:[%s987_s3 + $0x8] sm:$0xff]  ;;  %v732_v19 = vld [vmem:[%s987_s3] sm:$0xff] }
  0x12   : > { %438 = vmatpush.bf16.msra.mxu1 %v738_v7  ;;  %749 = vmatpush.bf16.msra.mxu3 %v738_v7  ;;  %v764_v21 = vld [vmem:[%s986_s2] ss:$0 sm:$0xff] }
  0x13   : > { %v765_v51 = vld [vmem:[%s988_s4] ss:$0 sm:$0xff] }
  0x14   : > { %330 = vmatpush.bf16.msra.mxu0 %v729_v2  ;;  %742 = vmatpush.bf16.msra.mxu2 %v729_v2 }
  0x16   : > { %439 = vmatpush.bf16.msra.mxu1 %v737_v9  ;;  %750 = vmatpush.bf16.msra.mxu3 %v737_v9 }
  0x18   : > { %331 = vmatpush.bf16.msra.mxu0 %v728_v3  ;;  %743 = vmatpush.bf16.msra.mxu2 %v728_v3 }
  0x1a   : > { %440 = vmatpush.bf16.msra.mxu1 %v736_v11  ;;  %751 = vmatpush.bf16.msra.mxu3 %v736_v11 }
  0x1c   : > { %332 = vmatpush.bf16.msra.mxu0 %v727_v4  ;;  %744 = vmatpush.bf16.msra.mxu2 %v727_v4 }
  0x1e   : > { %441 = vmatpush.bf16.msra.mxu1 %v735_v16  ;;  %752 = vmatpush.bf16.msra.mxu3 %v735_v16 }
  0x20   : > { %333 = vmatpush.bf16.msra.mxu0 %v726_v6  ;;  %745 = vmatpush.bf16.msra.mxu2 %v726_v6 }
  0x22   : > { %442 = vmatpush.bf16.msra.mxu1 %v734_v17  ;;  %753 = vmatpush.bf16.msra.mxu3 %v734_v17 }
  0x24   : > { %334 = vmatpush.bf16.msra.mxu0 %v725_v8  ;;  %746 = vmatpush.bf16.msra.mxu2 %v725_v8 }
  0x26   : > { %443 = vmatpush.bf16.msra.mxu1 %v733_v18  ;;  %754 = vmatpush.bf16.msra.mxu3 %v733_v18 }
  0x28   : > { %335 = vmatpush.bf16.msra.mxu0 %v724_v10  ;;  %747 = vmatpush.bf16.msra.mxu2 %v724_v10 }
  0x2a   : > { %444 = vmatpush.bf16.msra.mxu1 %v732_v19  ;;  %755 = vmatpush.bf16.msra.mxu3 %v732_v19 }
  0x2b   : > { %336 = vmatmul.bf16.vlgmr.msra.gmra.mxu0 %v720_v12  ;;  %346 = vmatmul.bf16.vlgmr.msra.gmra.mxu2 %v722_v13 }
  0x3b   : > { %341 = vmatmul.bf16.gmra.mxu0 %v721_v14  ;;  %351 = vmatmul.bf16.gmra.mxu2 %v723_v15 }
  0xa8   : > { %v337_v20 = vpop.f32.mrf.mxu0 }
  0xa9   : > { %v338_v23 = vadd.f32 %v764_v21, %v337_v20 }
  0xab   : > { %v357_v26 = vmax.f32 %v338_v23, 0.0 }
  0xae   : > { %v347_v22 = vpop.f32.mrf.mxu2 }
  0xaf   : > { %v348_v28 = vadd.f32 %v764_v21, %v347_v22 }
  0xb0   : > { %v339_v24 = vpop.f32.mrf.mxu0 }
  0xb1   : > { %v340_v25 = vadd.f32 %v764_v21, %v339_v24  ;;  %v361_v33 = vmax.f32 %v348_v28, 0.0 }
  0xb3   : > { %v358_v27 = vmax.f32 %v340_v25, 0.0 }
  0xb5   : > { %v365_v29 = vpack.c.bf16 %v358_v27, %v357_v26 }
  0xb6   : > { %v349_v30 = vpop.f32.mrf.mxu2 }
  0xb7   : > { %v350_v31 = vadd.f32 %v764_v21, %v349_v30  ;;  %445 = vmatmul.bf16.vlgmr.msra.gmra.mxu1 %v365_v29 }
  0xb8   : > { %v342_v32 = vpop.f32.mrf.mxu0 }
  0xb9   : > { %v362_v34 = vmax.f32 %v350_v31, 0.0  ;;  %v343_v37 = vadd.f32 %v764_v21, %v342_v32 }
  0xbb   : > { %v367_v35 = vpack.c.bf16 %v362_v34, %v361_v33  ;;  %v359_v40 = vmax.f32 %v343_v37, 0.0 }
  0xbd   : > { %455 = vmatmul.bf16.vlgmr.msra.gmra.mxu3 %v367_v35 }
  0xbe   : > { %v352_v36 = vpop.f32.mrf.mxu2 }
  0xbf   : > { %v353_v42 = vadd.f32 %v764_v21, %v352_v36 }
  0xc0   : > { %v344_v38 = vpop.f32.mrf.mxu0 }
  0xc1   : > { %v345_v39 = vadd.f32 %v764_v21, %v344_v38  ;;  %v363_v46 = vmax.f32 %v353_v42, 0.0 }
  0xc3   : > { %v360_v41 = vmax.f32 %v345_v39, 0.0 }
  0xc5   : > { %v366_v43 = vpack.c.bf16 %v360_v41, %v359_v40 }
  0xc6   : > { %v354_v44 = vpop.f32.mrf.mxu2 }
  0xc7   : > { %v355_v45 = vadd.f32 %v764_v21, %v354_v44  ;;  %450 = vmatmul.bf16.gmra.mxu1 %v366_v43 }
  0xc9   : > { %v364_v47 = vmax.f32 %v355_v45, 0.0 }
  0xcb   : > { %v368_v48 = vpack.c.bf16 %v364_v47, %v363_v46 }
  0xcd   : > { %460 = vmatmul.bf16.gmra.mxu3 %v368_v48 }
 0x134   : > { %v446_v52 = vpop.f32.mrf.mxu1 }
 0x135   : > { %v447_v53 = vadd.f32 %v765_v51, %v446_v52 }
 0x137   : > { %v469_v54 = vsel %vm468_vm0, %v447_v53, -1e+30 }
 0x138   : > { %477 = vmax.xlane.f32.xlu0 %v469_v54 }
 0x13c   : > { %v448_v55 = vpop.f32.mrf.mxu1 }
 0x13d   : > { %v449_v56 = vadd.f32 %v765_v51, %v448_v55 }
 0x13f   : > { %v470_v57 = vsel %vm468_vm0, %v449_v56, -1e+30 }
 0x140   : > { %v456_v58 = vpop.f32.mrf.mxu3  ;;  %479 = vmax.xlane.f32.xlu0 %v470_v57 }
 0x141   : > { %v457_v59 = vadd.f32 %v765_v51, %v456_v58 }
 0x143   : > { %v473_v60 = vsel %vm468_vm0, %v457_v59, -1e+30 }
 0x144   : > { %485 = vmax.xlane.f32.xlu2 %v473_v60  ;;  %v451_v61 = vpop.f32.mrf.mxu1 }
 0x145   : > { %v452_v62 = vadd.f32 %v765_v51, %v451_v61 }
 0x147   : > { %v471_v63 = vsel %vm468_vm0, %v452_v62, -1e+30 }
 0x148   : > { %v458_v0 = vpop.f32.mrf.mxu3  ;;  %481 = vmax.xlane.f32.xlu1 %v471_v63 }
 0x149   : > { %v459_v1 = vadd.f32 %v765_v51, %v458_v0 }
 0x14b   : > { %v474_v2 = vsel %vm468_vm0, %v459_v1, -1e+30 }
 0x14c   : > { %487 = vmax.xlane.f32.xlu2 %v474_v2  ;;  %v453_v3 = vpop.f32.mrf.mxu1 }
 0x14d   : > { %v454_v4 = vadd.f32 %v765_v51, %v453_v3 }
 0x14f   : > { %v472_v5 = vsel %vm468_vm0, %v454_v4, -1e+30 }
 0x150   : > { %v461_v6 = vpop.f32.mrf.mxu3  ;;  %483 = vmax.xlane.f32.xlu1 %v472_v5 }
 0x151   : > { %v462_v7 = vadd.f32 %v765_v51, %v461_v6 }
 0x153   : > { %v475_v8 = vsel %vm468_vm0, %v462_v7, -1e+30 }
 0x154   : > { %489 = vmax.xlane.f32.xlu0 %v475_v8 }
 0x158   : > { %v463_v9 = vpop.f32.mrf.mxu3 }
 0x159   : > { %v464_v10 = vadd.f32 %v765_v51, %v463_v9 }
 0x15b   : > { %v476_v11 = vsel %vm468_vm0, %v464_v10, -1e+30 }
 0x15c   : > { %491 = vmax.xlane.f32.xlu1 %v476_v11 }
 0x1ab   : > { %v478_v12 = vpop.xlane.xlu0 %477 }
 0x1ac   : > { %v923_v13 = vsub.f32 %v447_v53, %v478_v12 }
 0x1ae   : > { %v501_v14 = vmul.f32 1.442695, %v923_v13 }
 0x1b0   : > { %766 = vpow2.f32 %v501_v14 }
 0x1b3   : > { %v480_v15 = vpop.xlane.xlu0 %479 }
 0x1b4   : > { %v926_v16 = vsub.f32 %v449_v56, %v480_v15 }
 0x1b6   : > { %v767_v17 = vpop.eup %766  ;;  %v503_v18 = vmul.f32 1.442695, %v926_v16 }
 0x1b7   : > { %v486_v19 = vpop.xlane.xlu2 %485  ;;  %v517_v20 = vsel %vm468_vm0, %v767_v17, 0.0 }
 0x1b8   : > { %768 = vpow2.f32 %v503_v18  ;;  %v931_v21 = vsub.f32 %v457_v59, %v486_v19  ;;  %525 = vadd.xlane.f32.xlu2 %v517_v20 }
 0x1ba   : > { %v509_v22 = vmul.f32 1.442695, %v931_v21 }
 0x1bb   : > { %v482_v23 = vpop.xlane.xlu1 %481 }
 0x1bc   : > { %v934_v24 = vsub.f32 %v452_v62, %v482_v23  ;;  %770 = vpow2.f32 %v509_v22 }
 0x1be   : > { %v769_v25 = vpop.eup %768  ;;  %v505_v26 = vmul.f32 1.442695, %v934_v24 }
 0x1bf   : > { %v488_v27 = vpop.xlane.xlu2 %487  ;;  %v518_v28 = vsel %vm468_vm0, %v769_v25, 0.0 }
 0x1c0   : > { %772 = vpow2.f32 %v505_v26  ;;  %v939_v29 = vsub.f32 %v459_v1, %v488_v27  ;;  %527 = vadd.xlane.f32.xlu0 %v518_v28 }
 0x1c2   : > { %v511_v30 = vmul.f32 1.442695, %v939_v29  ;;  %v771_v32 = vpop.eup %770 }
 0x1c3   : > { %v484_v31 = vpop.xlane.xlu1 %483  ;;  %v521_v38 = vsel %vm468_vm0, %v771_v32, 0.0 }
 0x1c4   : > { %v942_v33 = vsub.f32 %v454_v4, %v484_v31  ;;  %774 = vpow2.f32 %v511_v30 }
 0x1c6   : > { %v773_v34 = vpop.eup %772  ;;  %v507_v35 = vmul.f32 1.442695, %v942_v33 }
 0x1c7   : > { %v490_v36 = vpop.xlane.xlu0 %489  ;;  %v519_v37 = vsel %vm468_vm0, %v773_v34, 0.0 }
 0x1c8   : > { %776 = vpow2.f32 %v507_v35  ;;  %v949_v39 = vsub.f32 %v462_v7, %v490_v36  ;;  %529 = vadd.xlane.f32.xlu1 %v519_v37  ;;  %533 = vadd.xlane.f32.xlu0 %v521_v38 }
 0x1ca   : > { %v513_v40 = vmul.f32 1.442695, %v949_v39  ;;  %v775_v41 = vpop.eup %774 }
 0x1cb   : > { %v522_v44 = vsel %vm468_vm0, %v775_v41, 0.0 }
 0x1cc   : > { %778 = vpow2.f32 %v513_v40 }
 0x1ce   : > { %v777_v42 = vpop.eup %776 }
 0x1cf   : > { %v492_v43 = vpop.xlane.xlu1 %491  ;;  %v520_v45 = vsel %vm468_vm0, %v777_v42, 0.0 }
 0x1d0   : > { %v500_v46 = vsub.f32 %v464_v10, %v492_v43  ;;  %535 = vadd.xlane.f32.xlu1 %v522_v44  ;;  %531 = vadd.xlane.f32.xlu2 %v520_v45 }
 0x1d2   : > { %v515_v47 = vmul.f32 1.442695, %v500_v46  ;;  %v779_v48 = vpop.eup %778 }
 0x1d3   : > { %v523_v49 = vsel %vm468_vm0, %v779_v48, 0.0 }
 0x1d4   : > { %780 = vpow2.f32 %v515_v47 }
 0x1d8   : > { %537 = vadd.xlane.f32.xlu2 %v523_v49 }
 0x1da   : > { %v781_v51 = vpop.eup %780 }
 0x1db   : > { %v524_v52 = vsel %vm468_vm0, %v781_v51, 0.0 }
 0x1dc   : > { %539 = vadd.xlane.f32.xlu0 %v524_v52 }
 0x22b   : > { %v526_v53 = vpop.xlane.xlu2 %525 }
 0x22c   : > { %782 = vlog2.f32 %v526_v53 }
 0x232   : > { %v783_v54 = vpop.eup %782 }
 0x233   : > { %v542_v55 = vmul.f32 0.6931472, %v783_v54  ;;  %v528_v56 = vpop.xlane.xlu0 %527 }
 0x234   : > { %784 = vlog2.f32 %v528_v56 }
 0x235   : > { %v557_v57 = vsub.f32 %v923_v13, %v542_v55 }
 0x237   : > { %565 = vst [vmem:[%s964_s16] sm:$0xff] %v557_v57 }
 0x23a   : > { %v785_v50 = vpop.eup %784 }
 0x23b   : > { %v544_v58 = vmul.f32 0.6931472, %v785_v50  ;;  %v530_v59 = vpop.xlane.xlu1 %529  ;;  %v534_v60 = vpop.xlane.xlu0 %533 }
 0x23c   : > { %786 = vlog2.f32 %v530_v59 }
 0x23d   : > { %v558_v61 = vsub.f32 %v926_v16, %v544_v58  ;;  %788 = vlog2.f32 %v534_v60 }
 0x23f   : > { %566 = vst [vmem:[%s964_s16 + $0x8] sm:$0xff] %v558_v61 }
 0x242   : > { %v787_v62 = vpop.eup %786 }
 0x243   : > { %v789_v63 = vpop.eup %788  ;;  %v546_v0 = vmul.f32 0.6931472, %v787_v62  ;;  %v536_v1 = vpop.xlane.xlu1 %535 }
 0x244   : > { %v532_v2 = vpop.xlane.xlu2 %531  ;;  %v550_v3 = vmul.f32 0.6931472, %v789_v63  ;;  %790 = vlog2.f32 %v536_v1 }
 0x245   : > { %v559_v4 = vsub.f32 %v934_v24, %v546_v0  ;;  %792 = vlog2.f32 %v532_v2 }
 0x246   : > { %v561_v5 = vsub.f32 %v931_v21, %v550_v3 }
 0x247   : > { %567 = vst [vmem:[%s964_s16 + $0x10] sm:$0xff] %v559_v4 }
 0x248   : > { %569 = vst [vmem:[%s964_s16 + $0x20] sm:$0xff] %v561_v5 }
 0x24a   : > { %v791_v6 = vpop.eup %790 }
 0x24b   : > { %v793_v7 = vpop.eup %792  ;;  %v552_v8 = vmul.f32 0.6931472, %v791_v6 }
 0x24c   : > { %v538_v9 = vpop.xlane.xlu2 %537  ;;  %v548_v10 = vmul.f32 0.6931472, %v793_v7 }
 0x24d   : > { %794 = vlog2.f32 %v538_v9  ;;  %v562_v11 = vsub.f32 %v939_v29, %v552_v8 }
 0x24e   : > { %v560_v12 = vsub.f32 %v942_v33, %v548_v10 }
 0x24f   : > { %570 = vst [vmem:[%s964_s16 + $0x28] sm:$0xff] %v562_v11  ;;  %v540_v13 = vpop.xlane.xlu0 %539 }
 0x250   : > { %568 = vst [vmem:[%s964_s16 + $0x18] sm:$0xff] %v560_v12  ;;  %796 = vlog2.f32 %v540_v13 }
 0x253   : > { %v795_v14 = vpop.eup %794 }
 0x254   : > { %v554_v15 = vmul.f32 0.6931472, %v795_v14 }
 0x256   : > { %v563_v16 = vsub.f32 %v949_v39, %v554_v15  ;;  %v797_v17 = vpop.eup %796 }
 0x257   : > { %v556_v18 = vmul.f32 0.6931472, %v797_v17 }
 0x258   : > { %571 = vst [vmem:[%s964_s16 + $0x30] sm:$0xff] %v563_v16 }
 0x259   : > { %v564_v19 = vsub.f32 %v500_v46, %v556_v18 }
 0x25b   : > { %572 = vst [vmem:[%s964_s16 + $0x38] sm:$0xff] %v564_v19 }
 0x25c PF: > { %s15_s18 = sadd.s32 1, %s804_s18  }
 0x25d   : > { %p12_p4 = scmp.ge.s32.totalorder %s15_s18, 4  }
 0x25f   :  { %14 = sbr.rel (!%p12_p4) target bundleno = 1 (0x1), region = 70 }

</bundles_post_ra>
